<compile_context>
chip_gen: v7x
topology: tpu7x:2x2x1
jax: 0.10.0
libtpu: 0.0.40
codegen_flags: <defaults>
</compile_context>

<pallas_src>
import jax
import jax.numpy as jnp
from jax.experimental import pallas as pl
from jax.experimental.pallas import tpu as pltpu

HIDDEN = 64
LN_EPS = 1e-5


# --------------------------------------------------------------------------------------
# Kernel
# --------------------------------------------------------------------------------------
def delay_predictor_kernel(
    x_ref,                       # (TILE_B, input_dim+1)  bf16, last column == 1.0 (bias fold)
    wf_ref,                      # (input_dim+1, 64)      bf16, folded affine; last row == folded bias
    rw_ref,                      # (64, 1)                f32, every entry == 1/64 (MXU row-reduce)
    w1_ref, b1_ref,              # fc1 with LayerNorm affine folded in: (64, 32), (1, 32)
    w2_ref, b2_ref,              # fc2: (32, 16), (1, 16)
    w3_ref, b3_ref,              # out_delay as a row: (1, 16), (1, 1)
    out_ref,                     # (1, 1, TILE_B) f32 -- lane-dense output slab
):
    f32 = jnp.float32
    x = x_ref[...]

    # ---- input_layer + self-attention (seq_len == 1) + bias, all in one matmul (exact) ----
    attn = jnp.dot(x, wf_ref[...], preferred_element_type=f32)          # (TILE_B, 64)

    # ---- LayerNorm: both row reductions on the otherwise-idle MXU (no XLU reduce) ----
    rw = rw_ref[...]                                                    # (64, 1), 1/64 entries
    mean = jnp.dot(attn, rw, preferred_element_type=f32)                # (TILE_B, 1)
    cen = attn - mean
    var = jnp.dot(cen * cen, rw, preferred_element_type=f32)            # (TILE_B, 1)
    y = cen * jax.lax.rsqrt(var + LN_EPS)

    # ---- MLP head (Dropout == identity in eval mode); gamma/beta already in fc1 ----
    h1 = jnp.maximum(jnp.dot(y, w1_ref[...], preferred_element_type=f32) + b1_ref[...], 0.0)
    h2 = jnp.maximum(jnp.dot(h1, w2_ref[...], preferred_element_type=f32) + b2_ref[...], 0.0)

    # ---- 16 -> 1 projection as an NT matmul: (1,16) x (TILE_B,16)^T -> (1, TILE_B) ----
    # Lane-dense result -> unmasked full-lane vst instead of a last-dim-1 masked store.
    out_row = jax.lax.dot_general(
        w3_ref[...], h2,
        dimension_numbers=(((1,), (1,)), ((), ())),
        preferred_element_type=f32,
    ) + b3_ref[...]
    out_ref[...] = out_row[None]                                        # (1, 1, TILE_B)


# --------------------------------------------------------------------------------------
# Wrapper
# --------------------------------------------------------------------------------------
def delay_predictor_forward(x, folded, *, tile_b=2048):
    """x: (B, input_dim) float32.  folded: dict from fold_params()."""
    B, input_dim = x.shape
    assert tile_b % 128 == 0, "tile_b must be a multiple of 128 for the lane-dense output"

    padded = pl.cdiv(B, tile_b) * tile_b
    num_tiles = padded // tile_b

    # Constant-1 feature column carries the folded bias through the first matmul.
    x_aug = jnp.concatenate([x, jnp.ones((B, 1), x.dtype)], axis=1)
    if padded != B:
        x_aug = jnp.pad(x_aug, ((0, padded - B), (0, 0)))
    # bf16 halves the HBM-dominant x stream; accumulation stays f32 inside the kernel.
    x_aug = x_aug.astype(jnp.bfloat16)

    # Tiny resident weight used for both LN row-reductions on the MXU.
    reduce_w = jnp.full((HIDDEN, 1), 1.0 / HIDDEN, jnp.float32)

    weights = (
        folded["wf_aug"].astype(jnp.bfloat16),
        reduce_w,
        folded["w1_fold"], folded["b1_fold"],
        folded["w2_t"], folded["b2"],
        folded["w3"], folded["b3"],
    )

    def resident(a):
        nd = a.ndim
        # Constant block index -> weights are DMA'd once and stay resident in VMEM.
        return pl.BlockSpec(a.shape, lambda i, nd=nd: (0,) * nd)

    out = pl.pallas_call(
        delay_predictor_kernel,
        out_shape=jax.ShapeDtypeStruct((num_tiles, 1, tile_b), jnp.float32),
        grid=(num_tiles,),
        in_specs=[pl.BlockSpec((tile_b, input_dim + 1), lambda i: (i, 0))]
                 + [resident(a) for a in weights],
        out_specs=pl.BlockSpec((1, 1, tile_b), lambda i: (i, 0, 0)),
        compiler_params=pltpu.CompilerParams(
            # Independent batch tiles -> pipelined everywhere; on v7x consider
            # pltpu.CORE_PARALLEL here if a profile shows only one TC busy.
            dimension_semantics=("parallel",),
            # Safe on v5e (raises 16 MiB default) and well under physical VMEM everywhere.
            vmem_limit_bytes=32 * 1024 * 1024,
        ),
    )(x_aug, *weights)

    return out.reshape(padded, 1)[:B]


# --------------------------------------------------------------------------------------
# Parameters (PyTorch-equivalent, pre-transposed) and offline folding
# --------------------------------------------------------------------------------------
def init_params(key, input_dim, hidden=HIDDEN):
    # q/k projections of nn.MultiheadAttention are omitted on purpose: with seq_len == 1
    # the softmax over a single key is exactly 1, so they cancel out of the forward pass.
    ks = jax.random.split(key, 12)
    n = lambda k, shape, s=0.05: (s * jax.random.normal(k, shape)).astype(jnp.float32)
    return {
        "w_in_t": n(ks[0], (input_dim, hidden)), "b_in": n(ks[1], (1, hidden)),
        "w_v_t":  n(ks[2], (hidden, hidden)),    "b_v":  n(ks[3], (1, hidden)),
        "w_o_t":  n(ks[4], (hidden, hidden)),    "b_o":  n(ks[5], (1, hidden)),
        "gamma":  jnp.ones((1, hidden), jnp.float32),
        "beta":   jnp.zeros((1, hidden), jnp.float32),
        "w1_t":   n(ks[6], (hidden, 32)),        "b1":   n(ks[7], (1, 32)),
        "w2_t":   n(ks[8], (32, 16)),            "b2":   n(ks[9], (1, 16)),
        "w3_t":   n(ks[10], (16, 1)),            "b3":   n(ks[11], (1, 1)),
    }


def fold_params(p):
    """Offline (host-side, once) folding of the seq_len==1 attention chain and LN affine."""
    w_fold = p["w_in_t"] @ p["w_v_t"] @ p["w_o_t"]                              # (input_dim, 64)
    b_fold = p["b_in"] @ p["w_v_t"] @ p["w_o_t"] + p["b_v"] @ p["w_o_t"] + p["b_o"]
    wf_aug = jnp.concatenate([w_fold, b_fold], axis=0)                          # (input_dim+1, 64)
    w1_fold = p["gamma"].reshape(-1, 1) * p["w1_t"]                             # fold gamma
    b1_fold = p["beta"] @ p["w1_t"] + p["b1"]                                   # fold beta
    return {
        "wf_aug": wf_aug,
        "w1_fold": w1_fold, "b1_fold": b1_fold,
        "w2_t": p["w2_t"], "b2": p["b2"],
        "w3": p["w3_t"].T,          # (1, 16) row for the lane-dense NT matmul
        "b3": p["b3"],
    }


def reference_forward(x, p):
    """Plain-JAX f32 reference of the exact PyTorch forward (eval mode), unfolded."""
    h = x @ p["w_in_t"] + p["b_in"]
    # softmax over a single key == 1  ->  attention output == out_proj(v_proj(h))
    v = h @ p["w_v_t"] + p["b_v"]
    attn = v @ p["w_o_t"] + p["b_o"]
    mean = jnp.mean(attn, axis=-1, keepdims=True)
    var = jnp.mean((attn - mean) ** 2, axis=-1, keepdims=True)
    y = (attn - mean) / jnp.sqrt(var + LN_EPS) * p["gamma"] + p["beta"]
    h1 = jnp.maximum(y @ p["w1_t"] + p["b1"], 0.0)      # Dropout -> identity (eval)
    h2 = jnp.maximum(h1 @ p["w2_t"] + p["b2"], 0.0)
    return h2 @ p["w3_t"] + p["b3"]


if __name__ == "__main__":
    INPUT_DIM = 16
    B = 300          # small; not a tile multiple -> exercises padding + a multi-step grid
    key = jax.random.PRNGKey(0)
    kx, kp = jax.random.split(key)
    x = jax.random.normal(kx, (B, INPUT_DIM), dtype=jnp.float32)

    params = init_params(kp, INPUT_DIM)
    folded = fold_params(params)

    out = delay_predictor_forward(x, folded, tile_b=128)
    out = jax.block_until_ready(out)

    ref = reference_forward(x, params)
    assert out.shape == (B, 1)
    assert jnp.allclose(out, ref, atol=2e-2, rtol=2e-2), float(jnp.max(jnp.abs(out - ref)))

    print("KERNEL_OK")
</pallas_src>

<mosaic_0001>
module attributes {stable_mosaic.version = 11 : i64} {
  func.func @delay_predictor_kernel(%arg0: i32, %arg1: memref<128x17xbf16, #tpu.memory_space<vmem>>, %arg2: memref<17x64xbf16, #tpu.memory_space<vmem>>, %arg3: memref<64x1xf32, #tpu.memory_space<vmem>>, %arg4: memref<64x32xf32, #tpu.memory_space<vmem>>, %arg5: memref<1x32xf32, #tpu.memory_space<vmem>>, %arg6: memref<32x16xf32, #tpu.memory_space<vmem>>, %arg7: memref<1x16xf32, #tpu.memory_space<vmem>>, %arg8: memref<1x16xf32, #tpu.memory_space<vmem>>, %arg9: memref<1x1xf32, #tpu.memory_space<vmem>>, %arg10: memref<1x1x128xf32, #tpu.memory_space<vmem>>) attributes {dimension_semantics = [#tpu.dimension_semantics<parallel>], iteration_bounds = array<i64: 3>, scalar_prefetch = 0 : i64, scratch_operands = 0 : i64, tpu.core_type = #tpu.core_type<tc>, window_params = [{transform_indices = @transform_0, window_bounds = array<i64: 128, 17>}, {pipeline_mode = #tpu.pipeline_mode<synchronous>, transform_indices = @transform_1, window_bounds = array<i64: 17, 64>}, {pipeline_mode = #tpu.pipeline_mode<synchronous>, transform_indices = @transform_2, window_bounds = array<i64: 64, 1>}, {pipeline_mode = #tpu.pipeline_mode<synchronous>, transform_indices = @transform_3, window_bounds = array<i64: 64, 32>}, {pipeline_mode = #tpu.pipeline_mode<synchronous>, transform_indices = @transform_4, window_bounds = array<i64: 1, 32>}, {pipeline_mode = #tpu.pipeline_mode<synchronous>, transform_indices = @transform_5, window_bounds = array<i64: 32, 16>}, {pipeline_mode = #tpu.pipeline_mode<synchronous>, transform_indices = @transform_6, window_bounds = array<i64: 1, 16>}, {pipeline_mode = #tpu.pipeline_mode<synchronous>, transform_indices = @transform_7, window_bounds = array<i64: 1, 16>}, {pipeline_mode = #tpu.pipeline_mode<synchronous>, transform_indices = @transform_8, window_bounds = array<i64: 1, 1>}, {transform_indices = @transform_9, window_bounds = array<i64: 1, 1, 128>}]} {
    %c0 = arith.constant 0 : index
    %c0_0 = arith.constant 0 : index
    %0 = vector.load %arg1[%c0, %c0_0] : memref<128x17xbf16, #tpu.memory_space<vmem>>, vector<128x17xbf16>
    %c0_1 = arith.constant 0 : index
    %c0_2 = arith.constant 0 : index
    %1 = vector.load %arg2[%c0_1, %c0_2] : memref<17x64xbf16, #tpu.memory_space<vmem>>, vector<17x64xbf16>
    %cst = arith.constant dense<0.000000e+00> : vector<128x64xf32>
    %2 = tpu.matmul %0, %1, %cst {dimension_numbers = #tpu.dot_dimension_numbers<[1], [0], [0], [1], [0, 0, 1, 1], [], []>} : vector<128x17xbf16>, vector<17x64xbf16>, vector<128x64xf32> -> vector<128x64xf32>
    %c0_3 = arith.constant 0 : index
    %c0_4 = arith.constant 0 : index
    %3 = vector.load %arg3[%c0_3, %c0_4] : memref<64x1xf32, #tpu.memory_space<vmem>>, vector<64x1xf32>
    %cst_5 = arith.constant dense<0.000000e+00> : vector<128x1xf32>
    %4 = tpu.matmul %2, %3, %cst_5 {dimension_numbers = #tpu.dot_dimension_numbers<[1], [0], [0], [1], [0, 0, 1, 1], [], []>} : vector<128x64xf32>, vector<64x1xf32>, vector<128x1xf32> -> vector<128x1xf32>
    %5 = vector.broadcast %4 : vector<128x1xf32> to vector<128x64xf32>
    %6 = arith.subf %2, %5 : vector<128x64xf32>
    %7 = arith.mulf %6, %6 : vector<128x64xf32>
    %cst_6 = arith.constant dense<0.000000e+00> : vector<128x1xf32>
    %8 = tpu.matmul %7, %3, %cst_6 {dimension_numbers = #tpu.dot_dimension_numbers<[1], [0], [0], [1], [0, 0, 1, 1], [], []>} : vector<128x64xf32>, vector<64x1xf32>, vector<128x1xf32> -> vector<128x1xf32>
    %cst_7 = arith.constant 9.99999974E-6 : f32
    %9 = vector.broadcast %cst_7 : f32 to vector<128x1xf32>
    %10 = arith.addf %8, %9 : vector<128x1xf32>
    %11 = math.rsqrt %10 : vector<128x1xf32>
    %12 = vector.broadcast %11 : vector<128x1xf32> to vector<128x64xf32>
    %13 = arith.mulf %6, %12 : vector<128x64xf32>
    %c0_8 = arith.constant 0 : index
    %c0_9 = arith.constant 0 : index
    %14 = vector.load %arg4[%c0_8, %c0_9] : memref<64x32xf32, #tpu.memory_space<vmem>>, vector<64x32xf32>
    %cst_10 = arith.constant dense<0.000000e+00> : vector<128x32xf32>
    %15 = tpu.matmul %13, %14, %cst_10 {dimension_numbers = #tpu.dot_dimension_numbers<[1], [0], [0], [1], [0, 0, 1, 1], [], []>} : vector<128x64xf32>, vector<64x32xf32>, vector<128x32xf32> -> vector<128x32xf32>
    %c0_11 = arith.constant 0 : index
    %c0_12 = arith.constant 0 : index
    %16 = vector.load %arg5[%c0_11, %c0_12] : memref<1x32xf32, #tpu.memory_space<vmem>>, vector<1x32xf32>
    %17 = vector.broadcast %16 : vector<1x32xf32> to vector<128x32xf32>
    %18 = arith.addf %15, %17 : vector<128x32xf32>
    %cst_13 = arith.constant 0.000000e+00 : f32
    %19 = vector.broadcast %cst_13 : f32 to vector<128x32xf32>
    %20 = arith.maximumf %18, %19 : vector<128x32xf32>
    %c0_14 = arith.constant 0 : index
    %c0_15 = arith.constant 0 : index
    %21 = vector.load %arg6[%c0_14, %c0_15] : memref<32x16xf32, #tpu.memory_space<vmem>>, vector<32x16xf32>
    %cst_16 = arith.constant dense<0.000000e+00> : vector<128x16xf32>
    %22 = tpu.matmul %20, %21, %cst_16 {dimension_numbers = #tpu.dot_dimension_numbers<[1], [0], [0], [1], [0, 0, 1, 1], [], []>} : vector<128x32xf32>, vector<32x16xf32>, vector<128x16xf32> -> vector<128x16xf32>
    %c0_17 = arith.constant 0 : index
    %c0_18 = arith.constant 0 : index
    %23 = vector.load %arg7[%c0_17, %c0_18] : memref<1x16xf32, #tpu.memory_space<vmem>>, vector<1x16xf32>
    %24 = vector.broadcast %23 : vector<1x16xf32> to vector<128x16xf32>
    %25 = arith.addf %22, %24 : vector<128x16xf32>
    %cst_19 = arith.constant 0.000000e+00 : f32
    %26 = vector.broadcast %cst_19 : f32 to vector<128x16xf32>
    %27 = arith.maximumf %25, %26 : vector<128x16xf32>
    %c0_20 = arith.constant 0 : index
    %c0_21 = arith.constant 0 : index
    %28 = vector.load %arg8[%c0_20, %c0_21] : memref<1x16xf32, #tpu.memory_space<vmem>>, vector<1x16xf32>
    %cst_22 = arith.constant dense<0.000000e+00> : vector<1x128xf32>
    %29 = tpu.matmul %28, %27, %cst_22 {dimension_numbers = #tpu.dot_dimension_numbers<[1], [1], [0], [0], [0, 0, 1, 0], [], []>} : vector<1x16xf32>, vector<128x16xf32>, vector<1x128xf32> -> vector<1x128xf32>
    %c0_23 = arith.constant 0 : index
    %c0_24 = arith.constant 0 : index
    %30 = vector.load %arg9[%c0_23, %c0_24] : memref<1x1xf32, #tpu.memory_space<vmem>>, vector<1x1xf32>
    %31 = vector.broadcast %30 : vector<1x1xf32> to vector<1x128xf32>
    %32 = arith.addf %29, %31 : vector<1x128xf32>
    %33 = vector.shape_cast %32 : vector<1x128xf32> to vector<1x1x128xf32>
    %c0_25 = arith.constant 0 : index
    %c0_26 = arith.constant 0 : index
    %c0_27 = arith.constant 0 : index
    %34 = vector.load %arg10[%c0_25, %c0_26, %c0_27] : memref<1x1x128xf32, #tpu.memory_space<vmem>>, vector<1x1x128xf32>
    tpu.vector_store %arg10[%c0_25, %c0_26, %c0_27], %33 {strides = array<i32>} : memref<1x1x128xf32, #tpu.memory_space<vmem>>, vector<1x1x128xf32>,
    return
  }
  func.func @transform_0(%arg0: i32) -> (i32, i32) {
    %c0_i32 = arith.constant 0 : i32
    %c0_i32_0 = arith.constant 0 : i32
    return %arg0, %c0_i32 : i32, i32
  }
  func.func @transform_1(%arg0: i32) -> (i32, i32) {
    %c0_i32 = arith.constant 0 : i32
    %c0_i32_0 = arith.constant 0 : i32
    %c0_i32_1 = arith.constant 0 : i32
    return %c0_i32, %c0_i32_0 : i32, i32
  }
  func.func @transform_2(%arg0: i32) -> (i32, i32) {
    %c0_i32 = arith.constant 0 : i32
    %c0_i32_0 = arith.constant 0 : i32
    %c0_i32_1 = arith.constant 0 : i32
    return %c0_i32, %c0_i32_0 : i32, i32
  }
  func.func @transform_3(%arg0: i32) -> (i32, i32) {
    %c0_i32 = arith.constant 0 : i32
    %c0_i32_0 = arith.constant 0 : i32
    %c0_i32_1 = arith.constant 0 : i32
    return %c0_i32, %c0_i32_0 : i32, i32
  }
  func.func @transform_4(%arg0: i32) -> (i32, i32) {
    %c0_i32 = arith.constant 0 : i32
    %c0_i32_0 = arith.constant 0 : i32
    %c0_i32_1 = arith.constant 0 : i32
    return %c0_i32, %c0_i32_0 : i32, i32
  }
  func.func @transform_5(%arg0: i32) -> (i32, i32) {
    %c0_i32 = arith.constant 0 : i32
    %c0_i32_0 = arith.constant 0 : i32
    %c0_i32_1 = arith.constant 0 : i32
    return %c0_i32, %c0_i32_0 : i32, i32
  }
  func.func @transform_6(%arg0: i32) -> (i32, i32) {
    %c0_i32 = arith.constant 0 : i32
    %c0_i32_0 = arith.constant 0 : i32
    %c0_i32_1 = arith.constant 0 : i32
    return %c0_i32, %c0_i32_0 : i32, i32
  }
  func.func @transform_7(%arg0: i32) -> (i32, i32) {
    %c0_i32 = arith.constant 0 : i32
    %c0_i32_0 = arith.constant 0 : i32
    %c0_i32_1 = arith.constant 0 : i32
    return %c0_i32, %c0_i32_0 : i32, i32
  }
  func.func @transform_8(%arg0: i32) -> (i32, i32) {
    %c0_i32 = arith.constant 0 : i32
    %c0_i32_0 = arith.constant 0 : i32
    %c0_i32_1 = arith.constant 0 : i32
    return %c0_i32, %c0_i32_0 : i32, i32
  }
  func.func @transform_9(%arg0: i32) -> (i32, i32, i32) {
    %c0_i32 = arith.constant 0 : i32
    %c0_i32_0 = arith.constant 0 : i32
    %c0_i32_1 = arith.constant 0 : i32
    return %arg0, %c0_i32, %c0_i32_0 : i32, i32, i32
  }
}

</mosaic_0001>

<bundles_post_ra>
// kernel: tpu_custom_call.1
= control target key start
LH: loop header
LB: loop body
LE: loop exit
PB: predicated region body
PF: predicated region fallthrough
CT: control target
= control target key end

     0   :  { %s2951_s0 = inlined_call_operand.vmem [shape: bf16[384,17], index: 0, kind: input, shape index: {}]   ;;  %s2952_s1 = inlined_call_operand.vmem [shape: bf16[17,64], index: 1, kind: input, shape index: {}]   ;;  %s2953_s2 = inlined_call_operand.vmem [shape: f32[64,1], index: 2, kind: input, shape index: {}]   ;;  %s2954_s3 = inlined_call_operand.vmem [shape: f32[64,32], index: 3, kind: input, shape index: {}]   ;;  %s2955_s4 = inlined_call_operand.vmem [shape: f32[1,32], index: 4, kind: input, shape index: {}]   ;;  %s2956_s5 = inlined_call_operand.vmem [shape: f32[32,16], index: 5, kind: input, shape index: {}]   ;;  %s2957_s6 = inlined_call_operand.vmem [shape: f32[1,16], index: 6, kind: input, shape index: {}]   ;;  %s2958_s7 = inlined_call_operand.vmem [shape: f32[1,16], index: 7, kind: input, shape index: {}]   ;;  %s2959_s8 = inlined_call_operand.<no memory space> [shape: f32[1,1], index: 8, kind: input, shape index: {}]   ;;  %s2960_s9 = inlined_call_operand.hbm [shape: f32[3,1,128], index: 9, kind: output, shape index: {}]  }
   0x1   :  { %v14_v0 = vstv %s2959_s8 }
   0x2   :  { %15 = vst [vmem:[#allocation2] sm:$0x1] %v14_v0 }
   0x3   :  { %16 = vsyncpa [#allocation4], 0 }
   0x4   :  { %18 = vsyncpa [#allocation4 + $0x1], 0  ;;  %s2530_s11 = smov 0   ;;  %s2532_s12 = smov 0  }
   0x5   :  { %s2534_s13 = smov 0   ;;  %s2536_s14 = smov 0  }
   0x6 LB: > { %s1796_s8 = sadd.s32 4294967295, %s2470_s14   ;;  %s1797_s15 = sadd.s32 4294967294, %s2470_s14   ;;  %s2470_s14 = sphi %s2536_s14, %s2968_s14   ;;  %s2466_s13 = sphi %s2534_s13, %s2967_s13   ;;  %s2462_s12 = sphi %s2532_s12, %s2966_s12   ;;  %s2458_s11 = sphi %s2530_s11, %s2965_s11  }
   0x7   : > { %s2553_s16 = sadd.s32 1, %s2470_s14   ;;  %s225_s17 = sadd.s32 1, %s2466_s13 }
   0x8   : > { %s222_s18 = ssub.s32 %s2470_s14, %s2553_s16  ;;  %p235_p0 = scmp.ne.s32.totalorder %s2466_s13, %s2462_s12 }
   0x9   : > { %p223_p1 = scmp.eq.s32.totalorder %s222_s18, 0  ;;  %p236_p2 = scmp.eq.s32.totalorder %s1796_s8, 2 }
   0xa   : > { %p241_p3 = scmp.ne.s32.totalorder %s2462_s12, %s2458_s11  ;;  %p242_p4 = scmp.eq.s32.totalorder %s1797_s15, 2 }
   0xb   : > { %s2563_s19 = scalar_select %p223_p1, %s2466_s13, %s225_s17  }
   0xc   : > { %p2565_p5 = por %p236_p2, %p235_p0  ;;  %p2569_p6 = por %p242_p4, %p241_p3 }
   0xd   : > { %p1800_p7 = scmp.ge.s32.totalorder %s2470_s14, 1  ;;  %p293_p8 = scmp.lt.s32.totalorder %s2470_s14, 4 }
   0xf   : > { %p294_p9 = pnand %p1800_p7, %p293_p8 }
  0x10   : > { %v2366_v1 = vld [vmem:[%s2952_s1] sm:$0xff] (!%p294_p9)   ;;  %vm428_vm0 = vcmask (!%p294_p9), 1040384   ;;  %v2367_v2 = vld [vmem:[%s2952_s1 + $0x8] ss:$0 sps:$4 sm:$0x11] (!%p294_p9)   ;;  %v2472_v3 = vmov (!%p294_p9), 0  }
  0x11   : > { %297 = sbr.rel (%p294_p9) target bundleno = 1679 (0x68f), region = 56  ;;  %2026 = vmatprep.subr.bf16.mxu0 (!%p294_p9), %v2366_v1  ;;  %v430_v4 = vsel (!%p294_p9), %vm428_vm0, 65535, %v2472_v3  ;;  %s2581_s26 = sshll.u32 (!%p294_p9), %s1796_s8, 4  ;;  %v531_v5 = vld [vmem:[%s2953_s2] sm:$0xff] (!%p294_p9)  ;;  %v532_v6 = vld [vmem:[%s2953_s2 + $0x8] sm:$0xff] (!%p294_p9)  ;;  %v533_v7 = vld [vmem:[%s2953_s2 + $0x10] sm:$0xff] (!%p294_p9)  ;;  %2364 = vset.pattern.permute.xlu0 (!%p294_p9), %v2472_v3 }
  0x12   : > { %2027 = vmatpush3.bf16.msra.mxu0 (!%p294_p9), %v2366_v1  ;;  %v432_v8 = vand.u32 (!%p294_p9), %v2367_v2, %v430_v4  ;;  %p329_p10 = scmp.lt.s32.totalorder (!%p294_p9), %s2581_s26, 47  ;;  %v2233_v9 = vpack.c.bf16 (!%p294_p9), %v532_v6, %v531_v5  ;;  %v534_v10 = vld [vmem:[%s2953_s2 + $0x18] sm:$0xff] (!%p294_p9)  ;;  %2365 = vset.pattern.permute.xlu1 (!%p294_p9), %v2472_v3  ;;  %v535_v12 = vld [vmem:[%s2953_s2 + $0x20] sm:$0xff] (!%p294_p9)  ;;  %v536_v13 = vld [vmem:[%s2953_s2 + $0x28] sm:$0xff] (!%p294_p9)  ;;  %vm403_vm1 = vcmask (!%p294_p9), 138240   ;;  %vm539_vm2 = vcmask (!%p294_p9), 523264   ;;  %s2909_s10 = scalar_lea.hbm (!%p294_p9), %s2960_s9, %s2581_s26 }
  0x13   : > { %v2237_v11 = vpack.c.bf16 (!%p294_p9), %v534_v10, %v533_v7  ;;  %v2241_v14 = vpack.c.bf16 (!%p294_p9), %v536_v13, %v535_v12  ;;  %v537_v23 = vld [vmem:[%s2953_s2 + $0x30] sm:$0xff] (!%p294_p9)  ;;  %v538_v24 = vld [vmem:[%s2953_s2 + $0x38] sm:$0xff] (!%p294_p9)  ;;  %vm1385_vm3 = vcmask (!%p294_p9), 261120   ;;  %vm2474_vm4 = vmmov (!%p294_p9), 0   ;;  %s2476_s17 = smov (!%p294_p9), [#allocation3]  }
  0x14   : > { %2028 = vmatprep.subr.bf16.mxu0 (!%p294_p9), %v432_v8  ;;  %2234 = vmatprep.subr.bf16.mxu1 (!%p294_p9), %v2233_v9  ;;  %v2245_v25 = vpack.c.bf16 (!%p294_p9), %v538_v24, %v537_v23  ;;  %vm1606_vm5 = vcmask (!%p294_p9), 130048   ;;  %s2412_s18 = sshll.u32 (!%p294_p9), %s2476_s17, 4  ;;  %s2413_s18 = int_to_ptr.vmem [resolvable:$false] %s2412_s18 }
  0x15   : > { %2236 = vmatpush3.bf16.msra.mxu1 (!%p294_p9), %v2233_v9  ;;  %vm2873_vm6 = vmpackc.low (!%p294_p9), %vm1606_vm5, %vm1606_vm5  ;;  %s2414_s22 = scalar_lea.vmem (!%p294_p9), %s2413_s18, 32 }
  0x16   : > { %2029 = vmatpush3.bf16.msra.mxu0 (!%p294_p9), %v432_v8  ;;  %2238 = vmatprep.subr.bf16.mxu1 (!%p294_p9), %v2237_v11 }
  0x17   : > { %2250 = vmatprep.subr.bf16.mxu0 (!%p294_p9), %v2233_v9 }
  0x18   : > { %s330_s25 = scalar_select %p329_p10, %s2581_s26, 47 }
  0x19   : > { %2240 = vmatpush3.bf16.msra.mxu1 %v2237_v11 }
  0x1a   : > { %s1802_s27 = sshll.u32 %s330_s25, 2  ;;  %2242 = vmatprep.subr.bf16.mxu1 %v2241_v14  ;;  %s326_s25 = sand.u32 1, %s2462_s12  }
  0x1b   : > { %s332_s30 = scalar_lea.vmem %s2951_s0, %s1802_s27  ;;  %s327_s27 = scalar_lea.vmem [#allocation3], %s326_s25 }
  0x1c   : > { %v2368_v15 = vld [vmem:[%s332_s30] sm:$0xff]   ;;  %v2369_v16 = vld [vmem:[%s332_s30 + $0x8] sm:$0xff]   ;;  %v2370_v17 = vld [vmem:[%s332_s30 + $0x10] sm:$0xff]   ;;  %s1742_s28 = sshll.u32 %s327_s27, 4  ;;  %s1730_s15 = scalar_lea.sflag [#allocation4], %s326_s25  ;;  %s2911_s28 = int_to_ptr.vmem [resolvable:$true] %s1742_s28 }
  0x1d   : > { %2030 = vmatprep.mubr.msk.bf16.mxu0 %vm403_vm1, %v2368_v15  ;;  %2244 = vmatpush3.bf16.msra.mxu1 %v2241_v14  ;;  %v2371_v18 = vld [vmem:[%s332_s30 + $0x18] sm:$0xff]   ;;  %v2372_v19 = vld [vmem:[%s332_s30 + $0x20] sm:$0xff]   ;;  %v2373_v20 = vld [vmem:[%s332_s30 + $0x28] sm:$0xff]   ;;  %s2408_s8 = scalar_lea.vmem %s2911_s28, 16  ;;  %p2415_p0 = scmp.lt.s32.totalorder %s2911_s28, %s2413_s18 }
  0x1e   : > { %2031 = vmatmul.mubr.msk.bf16.vlgmr.msra.gmra.mrb[0].mxu0 %vm403_vm1, %v2369_v16  ;;  %v2374_v21 = vld [vmem:[%s332_s30 + $0x30] sm:$0xff]   ;;  %v2375_v22 = vld [vmem:[%s332_s30 + $0x38] sm:$0xff]   ;;  %2246 = vmatprep.subr.bf16.mxu1 %v2245_v25  ;;  %p2409_p11 = scmp.ne.s32.totalorder %s2911_s28, %s2408_s8  ;;  %p2416_p1 = scmp.lt.s32.totalorder %s2414_s22, %s2408_s8 }
  0x1f   : > { %2034 = vmatprep.mubr.msk.bf16.mxu0 %vm403_vm1, %v2370_v17  ;;  %2252 = vmatpush3.bf16.msra.mxu0 %v2233_v9 }
  0x20   : > { %2254 = vmatprep.subr.bf16.mxu0 %v2237_v11  ;;  %p2410_p12 = pnand %p2409_p11, %p2565_p5  ;;  %p2417_p2 = por %p2416_p1, %p2415_p0 }
  0x21   : > { %2248 = vmatpush3.bf16.msra.mxu1 %v2245_v25 }
  0x22   : > { %p2411_p13 = pneg %p2410_p12 }
  0x23   : > { %2256 = vmatpush3.bf16.msra.mxu0 %v2237_v11 }
  0x24   : > { %2258 = vmatprep.subr.bf16.mxu0 %v2241_v14  ;;  %p2418_p3 = pnand %p2417_p2, %p2411_p13 }
  0x26   : > { %2035 = vmatmul.mubr.msk.bf16.gmra.mrb[4].mxu0 %vm403_vm1, %v2371_v18 }
  0x27   : > { %2038 = vmatprep.mubr.msk.bf16.mxu0 %vm403_vm1, %v2372_v19  ;;  %2260 = vmatpush3.bf16.msra.mxu0 %v2241_v14 }
  0x28   : > { %2262 = vmatprep.subr.bf16.mxu0 %v2245_v25 }
  0x2b   : > { %2264 = vmatpush3.bf16.msra.mxu0 %v2245_v25 }
  0x2e   : > { %2039 = vmatmul.mubr.msk.bf16.gmra.mrb[8].mxu0 %vm403_vm1, %v2373_v20 }
  0x2f   : > { %2042 = vmatprep.mubr.msk.bf16.mxu0 %vm403_vm1, %v2374_v21 }
  0x36   : > { %2043 = vmatmul.mubr.msk.bf16.gmra.mrb[12].mxu0 %vm403_vm1, %v2375_v22 }
  0xf1   : > { %v2620_v26 = vpop.f32.mrb[0].mxu0 }
  0xf2   : > { %v2622_v27 = vpop.f32.mrb[1].mxu0 }
  0xf3   : > { %v2624_v28 = vpop.f32.mrb[2].mxu0  ;;  %2062 = vmatprep.mubr.msk.f32.mxu1 %vm539_vm2, %v2622_v27 }
  0xf4   : > { %v2628_v29 = vpop.f32.mrb[3].mxu0 }
  0xf5   : > { %2063 = vmatmul.mubr.msk.f32.vlgmr.msra.gmra.mrb[0].mxu1 %vm539_vm2, %v2628_v29 }
  0xf6   : > { %2065 = vmatprep.mubr.msk.f32.mxu1 %vm539_vm2, %v2620_v26 }
  0xf9   : > { %v2634_v30 = vpop.f32.mrb[4].mxu0  ;;  %2066 = vmatmul.mubr.msk.f32.gmra.mrb[2].mxu1 %vm539_vm2, %v2624_v28 }
  0xfa   : > { %v2638_v31 = vpop.f32.mrb[5].mxu0 }
  0xfb   : > { %v2640_v32 = vpop.f32.mrb[6].mxu0  ;;  %2068 = vmatprep.mubr.msk.f32.mxu1 %vm539_vm2, %v2638_v31 }
  0xfc   : > { %v2644_v33 = vpop.f32.mrb[7].mxu0 }
  0xfd   : > { %2069 = vmatmul.mubr.msk.f32.gmra.mrb[4].mxu1 %vm539_vm2, %v2644_v33 }
  0xfe   : > { %2071 = vmatprep.mubr.msk.f32.mxu1 %vm539_vm2, %v2634_v30 }
 0x101   : > { %v2650_v34 = vpop.f32.mrb[8].mxu0  ;;  %2072 = vmatmul.mubr.msk.f32.gmra.mrb[6].mxu1 %vm539_vm2, %v2640_v32 }
 0x102   : > { %v2654_v35 = vpop.f32.mrb[9].mxu0 }
 0x103   : > { %v2656_v36 = vpop.f32.mrb[10].mxu0  ;;  %2074 = vmatprep.mubr.msk.f32.mxu1 %vm539_vm2, %v2654_v35 }
 0x104   : > { %v2660_v37 = vpop.f32.mrb[11].mxu0 }
 0x105   : > { %2075 = vmatmul.mubr.msk.f32.gmra.mrb[8].mxu1 %vm539_vm2, %v2660_v37 }
 0x106   : > { %2077 = vmatprep.mubr.msk.f32.mxu1 %vm539_vm2, %v2650_v34 }
 0x109   : > { %v2666_v38 = vpop.f32.mrb[12].mxu0  ;;  %2078 = vmatmul.mubr.msk.f32.gmra.mrb[10].mxu1 %vm539_vm2, %v2656_v36 }
 0x10a   : > { %v2670_v39 = vpop.f32.mrb[13].mxu0 }
 0x10b   : > { %v2672_v40 = vpop.f32.mrb[14].mxu0  ;;  %2080 = vmatprep.mubr.msk.f32.mxu1 %vm539_vm2, %v2670_v39 }
 0x10c   : > { %v2676_v41 = vpop.f32.mrb[15].mxu0 }
 0x10d   : > { %2081 = vmatmul.mubr.msk.f32.gmra.mrb[12].mxu1 %vm539_vm2, %v2676_v41 }
 0x10e   : > { %2083 = vmatprep.mubr.msk.f32.mxu1 %vm539_vm2, %v2666_v38 }
 0x111   : > { %2084 = vmatmul.mubr.msk.f32.gmra.mrb[14].mxu1 %vm539_vm2, %v2672_v40 }
 0x1c8   : > { %v2064_v42 = vpop.f32.mrb[0].mxu1 }
 0x1c9   : > { %v654_v43 = vpop.f32.mrb[1].mxu1 }
 0x1ca   : > { %735 = vperm.xlu0 %2364, %v654_v43  }
 0x1cc   : > { %v2067_v44 = vpop.f32.mrb[2].mxu1 }
 0x1cd   : > { %v664_v45 = vpop.f32.mrb[3].mxu1 }
 0x1ce   : > { %740 = vperm.xlu0 %2364, %v2064_v42   ;;  %745 = vperm.xlu1 %2365, %v664_v45  }
 0x1d0   : > { %v2070_v46 = vpop.f32.mrb[4].mxu1 }
 0x1d1   : > { %v674_v47 = vpop.f32.mrb[5].mxu1 }
 0x1d2   : > { %750 = vperm.xlu1 %2365, %v2067_v44   ;;  %755 = vperm.xlu0 %2364, %v674_v47   ;;  %v1151_v44 = vld [vmem:[%s2954_s3 + $0x8] sm:$0xff] }
 0x1d4   : > { %v2073_v48 = vpop.f32.mrb[6].mxu1 }
 0x1d5   : > { %v684_v49 = vpop.f32.mrb[7].mxu1 }
 0x1d6   : > { %760 = vperm.xlu1 %2365, %v2070_v46   ;;  %765 = vperm.xlu0 %2364, %v684_v49   ;;  %v1153_v46 = vld [vmem:[%s2954_s3 + $0x18] sm:$0xff]  ;;  %v1155_v49 = vld [vmem:[%s2954_s3 + $0x28] sm:$0xff] }
 0x1d8   : > { %v2076_v50 = vpop.f32.mrb[8].mxu1 }
 0x1d9   : > { %v694_v51 = vpop.f32.mrb[9].mxu1 }
 0x1da   : > { %770 = vperm.xlu1 %2365, %v2073_v48   ;;  %775 = vperm.xlu0 %2364, %v694_v51   ;;  %v1154_v48 = vld [vmem:[%s2954_s3 + $0x20] sm:$0xff]  ;;  %v1156_v51 = vld [vmem:[%s2954_s3 + $0x30] sm:$0xff] }
 0x1dc   : > { %v2079_v52 = vpop.f32.mrb[10].mxu1 }
 0x1dd   : > { %v704_v53 = vpop.f32.mrb[11].mxu1 }
 0x1de   : > { %780 = vperm.xlu1 %2365, %v2076_v50   ;;  %785 = vperm.xlu0 %2364, %v704_v53   ;;  %v2273_v50 = vpack.c.bf16 %v1155_v49, %v1154_v48 }
 0x1e0   : > { %v2082_v54 = vpop.f32.mrb[12].mxu1 }
 0x1e1   : > { %v714_v55 = vpop.f32.mrb[13].mxu1 }
 0x1e2   : > { %790 = vperm.xlu1 %2365, %v2079_v52   ;;  %795 = vperm.xlu0 %2364, %v714_v55   ;;  %v1157_v52 = vld [vmem:[%s2954_s3 + $0x38] sm:$0xff] }
 0x1e3   : > { %v2277_v53 = vpack.c.bf16 %v1157_v52, %v1156_v51 }
 0x1e4   : > { %v2085_v56 = vpop.f32.mrb[14].mxu1 }
 0x1e5   : > { %v724_v57 = vpop.f32.mrb[15].mxu1 }
 0x1e6   : > { %800 = vperm.xlu1 %2365, %v2082_v54   ;;  %805 = vperm.xlu0 %2364, %v724_v57  }
 0x1ea   : > { %810 = vperm.xlu1 %2365, %v2085_v56  }
 0x249   : > { %v736_v58 = vpop.permute.xlu0 %735 }
 0x24a   : > { %v2685_v59 = vsub.f32 %v2622_v27, %v736_v58 }
 0x24c   : > { %v829_v60 = vmul.f32 %v2685_v59, %v2685_v59 }
 0x24d   : > { %v741_v61 = vpop.permute.xlu0 %740  ;;  %v746_v62 = vpop.permute.xlu1 %745 }
 0x24e   : > { %v2690_v63 = vsub.f32 %v2628_v29, %v741_v61  ;;  %v2693_v0 = vsub.f32 %v2620_v26, %v746_v62  ;;  %2102 = vmatprep.mubr.msk.f32.mxu0 %vm539_vm2, %v829_v60 }
 0x250   : > { %v830_v1 = vmul.f32 %v2690_v63, %v2690_v63  ;;  %v831_v2 = vmul.f32 %v2693_v0, %v2693_v0 }
 0x251   : > { %v751_v3 = vpop.permute.xlu1 %750  ;;  %v756_v4 = vpop.permute.xlu0 %755 }
 0x252   : > { %v2701_v5 = vsub.f32 %v2624_v28, %v751_v3  ;;  %v2704_v6 = vsub.f32 %v2638_v31, %v756_v4  ;;  %2103 = vmatmul.mubr.msk.f32.vlgmr.msra.gmra.mrb[16].mxu0 %vm539_vm2, %v830_v1 }
 0x253   : > { %2105 = vmatprep.mubr.msk.f32.mxu0 %vm539_vm2, %v831_v2 }
 0x254   : > { %v832_v7 = vmul.f32 %v2701_v5, %v2701_v5  ;;  %v833_v8 = vmul.f32 %v2704_v6, %v2704_v6 }
 0x255   : > { %v761_v9 = vpop.permute.xlu1 %760  ;;  %v766_v10 = vpop.permute.xlu0 %765 }
 0x256   : > { %v2713_v11 = vsub.f32 %v2644_v33, %v761_v9  ;;  %v2716_v12 = vsub.f32 %v2634_v30, %v766_v10  ;;  %2106 = vmatmul.mubr.msk.f32.gmra.mrb[18].mxu0 %vm539_vm2, %v832_v7 }
 0x257   : > { %2108 = vmatprep.mubr.msk.f32.mxu0 %vm539_vm2, %v833_v8 }
 0x258   : > { %v834_v13 = vmul.f32 %v2713_v11, %v2713_v11  ;;  %v835_v14 = vmul.f32 %v2716_v12, %v2716_v12 }
 0x259   : > { %v771_v15 = vpop.permute.xlu1 %770  ;;  %v776_v16 = vpop.permute.xlu0 %775 }
 0x25a   : > { %v2725_v17 = vsub.f32 %v2640_v32, %v771_v15  ;;  %v2728_v18 = vsub.f32 %v2654_v35, %v776_v16  ;;  %2109 = vmatmul.mubr.msk.f32.gmra.mrb[20].mxu0 %vm539_vm2, %v834_v13 }
 0x25b   : > { %2111 = vmatprep.mubr.msk.f32.mxu0 %vm539_vm2, %v835_v14 }
 0x25c   : > { %v836_v19 = vmul.f32 %v2725_v17, %v2725_v17  ;;  %v837_v20 = vmul.f32 %v2728_v18, %v2728_v18 }
 0x25d   : > { %v781_v21 = vpop.permute.xlu1 %780  ;;  %v786_v22 = vpop.permute.xlu0 %785 }
 0x25e   : > { %v2737_v23 = vsub.f32 %v2660_v37, %v781_v21  ;;  %v2740_v24 = vsub.f32 %v2650_v34, %v786_v22  ;;  %2112 = vmatmul.mubr.msk.f32.gmra.mrb[22].mxu0 %vm539_vm2, %v836_v19 }
 0x25f   : > { %2114 = vmatprep.mubr.msk.f32.mxu0 %vm539_vm2, %v837_v20 }
 0x260   : > { %v838_v25 = vmul.f32 %v2737_v23, %v2737_v23  ;;  %v839_v26 = vmul.f32 %v2740_v24, %v2740_v24 }
 0x261   : > { %v791_v27 = vpop.permute.xlu1 %790  ;;  %v796_v28 = vpop.permute.xlu0 %795 }
 0x262   : > { %v2749_v29 = vsub.f32 %v2656_v36, %v791_v27  ;;  %v2752_v30 = vsub.f32 %v2670_v39, %v796_v28  ;;  %2115 = vmatmul.mubr.msk.f32.gmra.mrb[24].mxu0 %vm539_vm2, %v838_v25 }
 0x263   : > { %2117 = vmatprep.mubr.msk.f32.mxu0 %vm539_vm2, %v839_v26 }
 0x264   : > { %v840_v31 = vmul.f32 %v2749_v29, %v2749_v29  ;;  %v841_v32 = vmul.f32 %v2752_v30, %v2752_v30 }
 0x265   : > { %v801_v33 = vpop.permute.xlu1 %800  ;;  %v806_v34 = vpop.permute.xlu0 %805 }
 0x266   : > { %v2761_v35 = vsub.f32 %v2676_v41, %v801_v33  ;;  %v2764_v36 = vsub.f32 %v2666_v38, %v806_v34  ;;  %2118 = vmatmul.mubr.msk.f32.gmra.mrb[26].mxu0 %vm539_vm2, %v840_v31  ;;  %v1150_v41 = vld [vmem:[%s2954_s3] sm:$0xff] }
 0x267   : > { %2120 = vmatprep.mubr.msk.f32.mxu0 %vm539_vm2, %v841_v32  ;;  %v2265_v45 = vpack.c.bf16 %v1151_v44, %v1150_v41 }
 0x268   : > { %v842_v37 = vmul.f32 %v2761_v35, %v2761_v35  ;;  %v843_v39 = vmul.f32 %v2764_v36, %v2764_v36 }
 0x269   : > { %v811_v42 = vpop.permute.xlu1 %810  ;;  %2266 = vmatprep.subr.bf16.mxu1 %v2265_v45 }
 0x26a   : > { %v2773_v43 = vsub.f32 %v2672_v40, %v811_v42  ;;  %2121 = vmatmul.mubr.msk.f32.gmra.mrb[28].mxu0 %vm539_vm2, %v842_v37  ;;  %v1152_v40 = vld [vmem:[%s2954_s3 + $0x10] sm:$0xff]  ;;  %2268 = vmatpush3.bf16.msra.mxu1 %v2265_v45 }
 0x26b   : > { %2123 = vmatprep.mubr.msk.f32.mxu0 %vm539_vm2, %v843_v39  ;;  %v2269_v47 = vpack.c.bf16 %v1153_v46, %v1152_v40 }
 0x26c   : > { %v844_v38 = vmul.f32 %v2773_v43, %v2773_v43 }
 0x26d   : > { %2270 = vmatprep.subr.bf16.mxu1 %v2269_v47 }
 0x26e   : > { %2124 = vmatmul.mubr.msk.f32.gmra.mrb[30].mxu0 %vm539_vm2, %v844_v38  ;;  %2272 = vmatpush3.bf16.msra.mxu1 %v2269_v47 }
 0x26f   : > { %2274 = vmatprep.subr.bf16.mxu1 %v2273_v50 }
 0x272   : > { %2276 = vmatpush3.bf16.msra.mxu1 %v2273_v50 }
 0x273   : > { %2278 = vmatprep.subr.bf16.mxu1 %v2277_v53 }
 0x276   : > { %2280 = vmatpush3.bf16.msra.mxu1 %v2277_v53 }
 0x325   : > { %v2104_v54 = vpop.f32.mrb[16].mxu0 }
 0x326   : > { %v965_v55 = vadd.f32 1e-05, %v2104_v54  ;;  %v959_v56 = vpop.f32.mrb[17].mxu0  ;;  %v1596_v54 = vld [vmem:[#allocation2] sm:$0x1] }
 0x327   : > { %v960_v57 = vadd.f32 1e-05, %v959_v56  ;;  %v1375_v56 = vld [vmem:[%s2956_s5 + $0x8] sm:$0xff] }
 0x328   : > { %2376 = vrsqrt.f32 %v965_v55  ;;  %v1374_v55 = vld [vmem:[%s2956_s5] sm:$0xff] }
 0x329   : > { %2378 = vrsqrt.f32 %v960_v57  ;;  %v2107_v58 = vpop.f32.mrb[18].mxu0  ;;  %v1376_v57 = vld [vmem:[%s2956_s5 + $0x10] sm:$0xff] }
 0x32a   : > { %v975_v60 = vadd.f32 1e-05, %v2107_v58  ;;  %v969_v61 = vpop.f32.mrb[19].mxu0  ;;  %v2281_v58 = vpack.c.bf16 %v1375_v56, %v1374_v55 }
 0x32b   : > { %v970_v62 = vadd.f32 1e-05, %v969_v61 }
 0x32c   : > { %2380 = vrsqrt.f32 %v975_v60  ;;  %v1377_v60 = vld [vmem:[%s2956_s5 + $0x18] sm:$0xff]  ;;  %2282 = vmatprep.subr.bf16.mxu0 %v2281_v58 }
 0x32d   : > { %2382 = vrsqrt.f32 %v970_v62  ;;  %v2110_v1 = vpop.f32.mrb[20].mxu0  ;;  %v2285_v61 = vpack.c.bf16 %v1377_v60, %v1376_v57  ;;  %2284 = vmatpush3.bf16.msra.mxu0 %v2281_v58 }
 0x32e   : > { %v985_v2 = vadd.f32 1e-05, %v2110_v1  ;;  %v979_v3 = vpop.f32.mrb[21].mxu0 }
 0x32f   : > { %v980_v4 = vadd.f32 1e-05, %v979_v3  ;;  %2286 = vmatprep.subr.bf16.mxu0 %v2285_v61 }
 0x330   : > { %2384 = vrsqrt.f32 %v985_v2 }
 0x331   : > { %2386 = vrsqrt.f32 %v980_v4  ;;  %v2113_v7 = vpop.f32.mrb[22].mxu0  ;;  %2288 = vmatpush3.bf16.msra.mxu0 %v2285_v61 }
 0x332   : > { %v2377_v8 = vpop.eup %2376  ;;  %v995_v9 = vadd.f32 1e-05, %v2113_v7  ;;  %v989_v10 = vpop.f32.mrb[23].mxu0 }
 0x333   : > { %v2379_v13 = vpop.eup %2378  ;;  %v990_v14 = vadd.f32 1e-05, %v989_v10  ;;  %1061 = vperm.xlu1 %2365, %v2377_v8  }
 0x334   : > { %2388 = vrsqrt.f32 %v995_v9  ;;  %1056 = vperm.xlu0 %2364, %v2379_v13  }
 0x335   : > { %2390 = vrsqrt.f32 %v990_v14  ;;  %v2116_v15 = vpop.f32.mrb[24].mxu0 }
 0x336   : > { %v2381_v16 = vpop.eup %2380  ;;  %v1005_v19 = vadd.f32 1e-05, %v2116_v15  ;;  %v999_v20 = vpop.f32.mrb[25].mxu0 }
 0x337   : > { %v2383_v21 = vpop.eup %2382  ;;  %v1000_v22 = vadd.f32 1e-05, %v999_v20  ;;  %1071 = vperm.xlu1 %2365, %v2381_v16  }
 0x338   : > { %2392 = vrsqrt.f32 %v1005_v19  ;;  %1066 = vperm.xlu0 %2364, %v2383_v21  }
 0x339   : > { %2394 = vrsqrt.f32 %v1000_v22  ;;  %v2119_v25 = vpop.f32.mrb[26].mxu0 }
 0x33a   : > { %v2385_v26 = vpop.eup %2384  ;;  %v1015_v27 = vadd.f32 1e-05, %v2119_v25  ;;  %v1009_v28 = vpop.f32.mrb[27].mxu0 }
 0x33b   : > { %v2387_v31 = vpop.eup %2386  ;;  %v1010_v32 = vadd.f32 1e-05, %v1009_v28  ;;  %1081 = vperm.xlu1 %2365, %v2385_v26  }
 0x33c   : > { %2396 = vrsqrt.f32 %v1015_v27  ;;  %1076 = vperm.xlu0 %2364, %v2387_v31  }
 0x33d   : > { %2398 = vrsqrt.f32 %v1010_v32  ;;  %v2122_v33 = vpop.f32.mrb[28].mxu0 }
 0x33e   : > { %v2389_v34 = vpop.eup %2388  ;;  %v1025_v37 = vadd.f32 1e-05, %v2122_v33  ;;  %v1019_v39 = vpop.f32.mrb[29].mxu0 }
 0x33f   : > { %v2391_v42 = vpop.eup %2390  ;;  %v1020_v38 = vadd.f32 1e-05, %v1019_v39  ;;  %1091 = vperm.xlu1 %2365, %v2389_v34  }
 0x340   : > { %2400 = vrsqrt.f32 %v1025_v37  ;;  %1086 = vperm.xlu0 %2364, %v2391_v42  }
 0x341   : > { %2402 = vrsqrt.f32 %v1020_v38  ;;  %v2125_v41 = vpop.f32.mrb[30].mxu0 }
 0x342   : > { %v2393_v44 = vpop.eup %2392  ;;  %v1035_v40 = vadd.f32 1e-05, %v2125_v41  ;;  %v1029_v45 = vpop.f32.mrb[31].mxu0 }
 0x343   : > { %v2395_v46 = vpop.eup %2394  ;;  %v1030_v47 = vadd.f32 1e-05, %v1029_v45  ;;  %1101 = vperm.xlu1 %2365, %v2393_v44  }
 0x344   : > { %2404 = vrsqrt.f32 %v1035_v40  ;;  %1096 = vperm.xlu0 %2364, %v2395_v46  }
 0x345   : > { %2406 = vrsqrt.f32 %v1030_v47 }
 0x346   : > { %v2397_v48 = vpop.eup %2396 }
 0x347   : > { %v2399_v49 = vpop.eup %2398  ;;  %1111 = vperm.xlu1 %2365, %v2397_v48  }
 0x348   : > { %1106 = vperm.xlu0 %2364, %v2399_v49  }
 0x34a   : > { %v2401_v50 = vpop.eup %2400 }
 0x34b   : > { %v2403_v51 = vpop.eup %2402  ;;  %1121 = vperm.xlu1 %2365, %v2401_v50  }
 0x34c   : > { %1116 = vperm.xlu0 %2364, %v2403_v51  }
 0x34e   : > { %v2405_v52 = vpop.eup %2404 }
 0x34f   : > { %v2407_v53 = vpop.eup %2406  ;;  %1131 = vperm.xlu1 %2365, %v2405_v52  }
 0x350   : > { %1126 = vperm.xlu0 %2364, %v2407_v53  }
 0x354   : > { %1599 = vperm.xlu0 %2364, %v1596_v54  }
 0x3b2   : > { %v1062_v62 = vpop.permute.xlu1 %1061 }
 0x3b3   : > { %v1057_v1 = vpop.permute.xlu0 %1056  ;;  %v1135_v3 = vmul.f32 %v1062_v62, %v2690_v63 }
 0x3b4   : > { %v1134_v2 = vmul.f32 %v1057_v1, %v2685_v59 }
 0x3b6   : > { %v1072_v4 = vpop.permute.xlu1 %1071  ;;  %2142 = vmatprep.mubr.msk.f32.mxu1 %vm539_vm2, %v1134_v2 }
 0x3b7   : > { %2143 = vmatmul.mubr.msk.f32.vlgmr.msra.gmra.mrb[16].mxu1 %vm539_vm2, %v1135_v3  ;;  %v1067_v7 = vpop.permute.xlu0 %1066  ;;  %v1137_v9 = vmul.f32 %v1072_v4, %v2701_v5 }
 0x3b8   : > { %v1136_v8 = vmul.f32 %v1067_v7, %v2693_v0 }
 0x3ba   : > { %v1082_v10 = vpop.permute.xlu1 %1081  ;;  %2145 = vmatprep.mubr.msk.f32.mxu1 %vm539_vm2, %v1136_v8 }
 0x3bb   : > { %2146 = vmatmul.mubr.msk.f32.gmra.mrb[18].mxu1 %vm539_vm2, %v1137_v9  ;;  %v1077_v13 = vpop.permute.xlu0 %1076  ;;  %v1139_v63 = vmul.f32 %v1082_v10, %v2713_v11 }
 0x3bc   : > { %v1138_v59 = vmul.f32 %v1077_v13, %v2704_v6 }
 0x3be   : > { %v1092_v14 = vpop.permute.xlu1 %1091  ;;  %2148 = vmatprep.mubr.msk.f32.mxu1 %vm539_vm2, %v1138_v59 }
 0x3bf   : > { %2149 = vmatmul.mubr.msk.f32.gmra.mrb[20].mxu1 %vm539_vm2, %v1139_v63  ;;  %v1087_v15 = vpop.permute.xlu0 %1086  ;;  %v1141_v5 = vmul.f32 %v1092_v14, %v2725_v17 }
 0x3c0   : > { %v1140_v0 = vmul.f32 %v1087_v15, %v2716_v12 }
 0x3c2   : > { %v1102_v16 = vpop.permute.xlu1 %1101  ;;  %2151 = vmatprep.mubr.msk.f32.mxu1 %vm539_vm2, %v1140_v0 }
 0x3c3   : > { %2152 = vmatmul.mubr.msk.f32.gmra.mrb[22].mxu1 %vm539_vm2, %v1141_v5  ;;  %v1097_v19 = vpop.permute.xlu0 %1096  ;;  %v1143_v11 = vmul.f32 %v1102_v16, %v2737_v23 }
 0x3c4   : > { %v1142_v6 = vmul.f32 %v1097_v19, %v2728_v18  ;;  %v2473_v19 = vmov 0.0|0.0  }
 0x3c5   : > { %2289 = vmatprep.subr.bf16.mxu1 %v2473_v19 }
 0x3c6   : > { %v1112_v20 = vpop.permute.xlu1 %1111  ;;  %2154 = vmatprep.mubr.msk.f32.mxu1 %vm539_vm2, %v1142_v6  ;;  %v2475_v6 = vmov 0.0  }
 0x3c7   : > { %2155 = vmatmul.mubr.msk.f32.gmra.mrb[24].mxu1 %vm539_vm2, %v1143_v11  ;;  %v1107_v21 = vpop.permute.xlu0 %1106  ;;  %v1145_v17 = vmul.f32 %v1112_v20, %v2749_v29  ;;  %v1870_v11 = vld [vmem:[%s2957_s6] ss:$0 sm:$0xff] }
 0x3c8   : > { %v1144_v12 = vmul.f32 %v1107_v21, %v2740_v24 }
 0x3ca   : > { %v1122_v22 = vpop.permute.xlu1 %1121  ;;  %2157 = vmatprep.mubr.msk.f32.mxu1 %vm539_vm2, %v1144_v12 }
 0x3cb   : > { %2158 = vmatmul.mubr.msk.f32.gmra.mrb[26].mxu1 %vm539_vm2, %v1145_v17  ;;  %v1117_v25 = vpop.permute.xlu0 %1116  ;;  %v1147_v23 = vmul.f32 %v1122_v22, %v2761_v35 }
 0x3cc   : > { %v1146_v18 = vmul.f32 %v1117_v25, %v2752_v30  ;;  %v1853_v30 = vld [vmem:[%s2955_s4] ss:$0 sm:$0xff] }
 0x3ce   : > { %v1132_v26 = vpop.permute.xlu1 %1131  ;;  %2160 = vmatprep.mubr.msk.f32.mxu1 %vm539_vm2, %v1146_v18 }
 0x3cf   : > { %2161 = vmatmul.mubr.msk.f32.gmra.mrb[28].mxu1 %vm539_vm2, %v1147_v23  ;;  %v1127_v27 = vpop.permute.xlu0 %1126  ;;  %v1149_v29 = vmul.f32 %v1132_v26, %v2773_v43 }
 0x3d0   : > { %v1148_v24 = vmul.f32 %v1127_v27, %v2764_v36 }
 0x3d2   : > { %2163 = vmatprep.mubr.msk.f32.mxu1 %vm539_vm2, %v1148_v24 }
 0x3d3   : > { %2164 = vmatmul.mubr.msk.f32.gmra.mrb[30].mxu1 %vm539_vm2, %v1149_v29 }
 0x3d4   : > { %2230 = vmatprep.mubr.msk.f32.mxu1 %vm2474_vm4, %v2475_v6  ;;  %v1600_v6 = vpop.permute.xlu0 %1599 }
 0x48a   : > { %v2144_v28 = vpop.f32.mrb[16].mxu1 }
 0x48b   : > { %v1285_v35 = vadd.f32 %v2144_v28, %v1853_v30  ;;  %v1279_v31 = vpop.f32.mrb[17].mxu1 }
 0x48c   : > { %v1280_v32 = vadd.f32 %v1853_v30, %v1279_v31 }
 0x48d   : > { %v1359_v37 = vmax.f32 %v1285_v35, 0.0 }
 0x48e   : > { %v1358_v33 = vmax.f32 %v1280_v32, 0.0  ;;  %v2147_v34 = vpop.f32.mrb[18].mxu1 }
 0x48f   : > { %v1295_v39 = vadd.f32 %v2147_v34, %v1853_v30  ;;  %v1289_v36 = vpop.f32.mrb[19].mxu1 }
 0x490   : > { %v1290_v42 = vadd.f32 %v1853_v30, %v1289_v36  ;;  %2174 = vmatprep.mubr.msk.f32.mxu0 %vm1385_vm3, %v1358_v33 }
 0x491   : > { %2175 = vmatmul.mubr.msk.f32.vlgmr.msra.gmra.mrb[32].mxu0 %vm1385_vm3, %v1359_v37  ;;  %v1361_v41 = vmax.f32 %v1295_v39, 0.0 }
 0x492   : > { %v1360_v43 = vmax.f32 %v1290_v42, 0.0  ;;  %v2150_v38 = vpop.f32.mrb[20].mxu1 }
 0x493   : > { %v1305_v44 = vadd.f32 %v2150_v38, %v1853_v30  ;;  %v1299_v40 = vpop.f32.mrb[21].mxu1 }
 0x494   : > { %v1300_v45 = vadd.f32 %v1853_v30, %v1299_v40  ;;  %2177 = vmatprep.mubr.msk.f32.mxu0 %vm1385_vm3, %v1360_v43 }
 0x495   : > { %2178 = vmatmul.mubr.msk.f32.gmra.mrb[34].mxu0 %vm1385_vm3, %v1361_v41  ;;  %v1363_v48 = vmax.f32 %v1305_v44, 0.0 }
 0x496   : > { %v1362_v46 = vmax.f32 %v1300_v45, 0.0  ;;  %v2153_v47 = vpop.f32.mrb[22].mxu1 }
 0x497   : > { %v1315_v49 = vadd.f32 %v2153_v47, %v1853_v30  ;;  %v1309_v50 = vpop.f32.mrb[23].mxu1 }
 0x498   : > { %v1310_v51 = vadd.f32 %v1853_v30, %v1309_v50  ;;  %2180 = vmatprep.mubr.msk.f32.mxu0 %vm1385_vm3, %v1362_v46 }
 0x499   : > { %2181 = vmatmul.mubr.msk.f32.gmra.mrb[36].mxu0 %vm1385_vm3, %v1363_v48  ;;  %v1365_v54 = vmax.f32 %v1315_v49, 0.0 }
 0x49a   : > { %v1364_v52 = vmax.f32 %v1310_v51, 0.0  ;;  %v2156_v53 = vpop.f32.mrb[24].mxu1 }
 0x49b   : > { %v1325_v55 = vadd.f32 %v2156_v53, %v1853_v30  ;;  %v1319_v56 = vpop.f32.mrb[25].mxu1 }
 0x49c   : > { %v1320_v57 = vadd.f32 %v1853_v30, %v1319_v56  ;;  %2183 = vmatprep.mubr.msk.f32.mxu0 %vm1385_vm3, %v1364_v52 }
 0x49d   : > { %2184 = vmatmul.mubr.msk.f32.gmra.mrb[38].mxu0 %vm1385_vm3, %v1365_v54  ;;  %v1367_v61 = vmax.f32 %v1325_v55, 0.0 }
 0x49e   : > { %v1366_v58 = vmax.f32 %v1320_v57, 0.0  ;;  %v2159_v60 = vpop.f32.mrb[26].mxu1 }
 0x49f   : > { %v1335_v62 = vadd.f32 %v2159_v60, %v1853_v30  ;;  %v1329_v1 = vpop.f32.mrb[27].mxu1 }
 0x4a0   : > { %v1330_v2 = vadd.f32 %v1853_v30, %v1329_v1  ;;  %2186 = vmatprep.mubr.msk.f32.mxu0 %vm1385_vm3, %v1366_v58 }
 0x4a1   : > { %2187 = vmatmul.mubr.msk.f32.gmra.mrb[40].mxu0 %vm1385_vm3, %v1367_v61  ;;  %v1369_v7 = vmax.f32 %v1335_v62, 0.0 }
 0x4a2   : > { %v1368_v3 = vmax.f32 %v1330_v2, 0.0  ;;  %v2162_v4 = vpop.f32.mrb[28].mxu1 }
 0x4a3   : > { %v1345_v8 = vadd.f32 %v2162_v4, %v1853_v30  ;;  %v1339_v9 = vpop.f32.mrb[29].mxu1 }
 0x4a4   : > { %v1340_v10 = vadd.f32 %v1853_v30, %v1339_v9  ;;  %2189 = vmatprep.mubr.msk.f32.mxu0 %vm1385_vm3, %v1368_v3 }
 0x4a5   : > { %2190 = vmatmul.mubr.msk.f32.gmra.mrb[42].mxu0 %vm1385_vm3, %v1369_v7  ;;  %v1371_v63 = vmax.f32 %v1345_v8, 0.0 }
 0x4a6   : > { %v1370_v13 = vmax.f32 %v1340_v10, 0.0  ;;  %v2165_v59 = vpop.f32.mrb[30].mxu1 }
 0x4a7   : > { %v1355_v14 = vadd.f32 %v2165_v59, %v1853_v30  ;;  %v1349_v15 = vpop.f32.mrb[31].mxu1 }
 0x4a8   : > { %v1350_v0 = vadd.f32 %v1853_v30, %v1349_v15  ;;  %2192 = vmatprep.mubr.msk.f32.mxu0 %vm1385_vm3, %v1370_v13  ;;  %v1595_v15 = vld [vmem:[%s2958_s7] sm:$0x1] }
 0x4a9   : > { %2193 = vmatmul.mubr.msk.f32.gmra.mrb[44].mxu0 %vm1385_vm3, %v1371_v63  ;;  %v1373_v16 = vmax.f32 %v1355_v14, 0.0 }
 0x4aa   : > { %v1372_v5 = vmax.f32 %v1350_v0, 0.0  ;;  %v1602_v0 = vlaneseq }
 0x4ac   : > { %2195 = vmatprep.mubr.msk.f32.mxu0 %vm1385_vm3, %v1372_v5  ;;  %v1603_v5 = vshrl.u32 %v1602_v0, 7 }
 0x4ad   : > { %2196 = vmatmul.mubr.msk.f32.gmra.mrb[46].mxu0 %vm1385_vm3, %v1373_v16 }
 0x4ae   : > { %v1604_v16 = vsub.s32 0, %v1603_v5 }
 0x564   : > { %v2176_v20 = vpop.f32.mrb[32].mxu0 }
 0x565   : > { %v1506_v21 = vadd.f32 %v2176_v20, %v1870_v11  ;;  %v1500_v12 = vpop.f32.mrb[33].mxu0 }
 0x566   : > { %v1501_v17 = vadd.f32 %v1870_v11, %v1500_v12 }
 0x567   : > { %v1580_v22 = vmax.f32 %v1506_v21, 0.0 }
 0x568   : > { %v1579_v25 = vmax.f32 %v1501_v17, 0.0  ;;  %v2179_v18 = vpop.f32.mrb[34].mxu0 }
 0x569   : > { %v1516_v23 = vadd.f32 %v2179_v18, %v1870_v11  ;;  %v1510_v26 = vpop.f32.mrb[35].mxu0 }
 0x56a   : > { %v2290_v24 = vpack.c.bf16 %v1580_v22, %v1579_v25  ;;  %v1511_v29 = vadd.f32 %v1870_v11, %v1510_v26 }
 0x56b   : > { %v1582_v30 = vmax.f32 %v1516_v23, 0.0 }
 0x56c   : > { %v1581_v28 = vmax.f32 %v1511_v29, 0.0  ;;  %v2182_v35 = vpop.f32.mrb[36].mxu0  ;;  %2292 = vmatpush3.bf16.xpose.msk.msra.mxu1 %vm2873_vm6, %v2290_v24 }
 0x56d   : > { %v1526_v31 = vadd.f32 %v2182_v35, %v1870_v11  ;;  %v1520_v32 = vpop.f32.mrb[37].mxu0  ;;  %2293 = vmatprep.subr.bf16.mxu1 %v2473_v19 }
 0x56e   : > { %v2294_v33 = vpack.c.bf16 %v1582_v30, %v1581_v28  ;;  %v1521_v34 = vadd.f32 %v1870_v11, %v1520_v32 }
 0x56f   : > { %v1584_v37 = vmax.f32 %v1526_v31, 0.0 }
 0x570   : > { %v1583_v39 = vmax.f32 %v1521_v34, 0.0  ;;  %v2185_v36 = vpop.f32.mrb[38].mxu0 }
 0x571   : > { %v1536_v42 = vadd.f32 %v2185_v36, %v1870_v11  ;;  %v1530_v43 = vpop.f32.mrb[39].mxu0 }
 0x572   : > { %v2298_v38 = vpack.c.bf16 %v1584_v37, %v1583_v39  ;;  %v1531_v41 = vadd.f32 %v1870_v11, %v1530_v43 }
 0x573   : > { %v1586_v44 = vmax.f32 %v1536_v42, 0.0 }
 0x574   : > { %v1585_v40 = vmax.f32 %v1531_v41, 0.0  ;;  %v2188_v45 = vpop.f32.mrb[40].mxu0  ;;  %2296 = vmatpush3.bf16.xpose.msk.msra.mxu1 %vm2873_vm6, %v2294_v33 }
 0x575   : > { %v1546_v46 = vadd.f32 %v2188_v45, %v1870_v11  ;;  %v1540_v47 = vpop.f32.mrb[41].mxu0  ;;  %2297 = vmatprep.subr.bf16.mxu1 %v2473_v19 }
 0x576   : > { %v2302_v48 = vpack.c.bf16 %v1586_v44, %v1585_v40  ;;  %v1541_v49 = vadd.f32 %v1870_v11, %v1540_v47 }
 0x577   : > { %v1588_v50 = vmax.f32 %v1546_v46, 0.0 }
 0x578   : > { %v1587_v51 = vmax.f32 %v1541_v49, 0.0  ;;  %v2191_v52 = vpop.f32.mrb[42].mxu0 }
 0x579   : > { %v1556_v53 = vadd.f32 %v2191_v52, %v1870_v11  ;;  %v1550_v54 = vpop.f32.mrb[43].mxu0 }
 0x57a   : > { %v2306_v55 = vpack.c.bf16 %v1588_v50, %v1587_v51  ;;  %v1551_v56 = vadd.f32 %v1870_v11, %v1550_v54 }
 0x57b   : > { %v1590_v57 = vmax.f32 %v1556_v53, 0.0 }
 0x57c   : > { %v1589_v58 = vmax.f32 %v1551_v56, 0.0  ;;  %v2194_v60 = vpop.f32.mrb[44].mxu0  ;;  %2300 = vmatpush3.bf16.xpose.msk.msra.mxu1 %vm2873_vm6, %v2298_v38 }
 0x57d   : > { %v1566_v61 = vadd.f32 %v2194_v60, %v1870_v11  ;;  %v1560_v62 = vpop.f32.mrb[45].mxu0  ;;  %2301 = vmatprep.subr.bf16.mxu1 %v2473_v19 }
 0x57e   : > { %v2310_v1 = vpack.c.bf16 %v1590_v57, %v1589_v58  ;;  %v1561_v2 = vadd.f32 %v1870_v11, %v1560_v62 }
 0x57f   : > { %v1592_v3 = vmax.f32 %v1566_v61, 0.0 }
 0x580   : > { %v1591_v4 = vmax.f32 %v1561_v2, 0.0  ;;  %v2197_v7 = vpop.f32.mrb[46].mxu0 }
 0x581   : > { %v1576_v8 = vadd.f32 %v2197_v7, %v1870_v11  ;;  %v1570_v9 = vpop.f32.mrb[47].mxu0 }
 0x582   : > { %v2314_v10 = vpack.c.bf16 %v1592_v3, %v1591_v4  ;;  %v1571_v13 = vadd.f32 %v1870_v11, %v1570_v9  ;;  %v1605_v11 = vrot.slane %v1600_v6, %v1604_v16 }
 0x583   : > { %v1594_v59 = vmax.f32 %v1576_v8, 0.0 }
 0x584   : > { %v1593_v63 = vmax.f32 %v1571_v13, 0.0  ;;  %2304 = vmatpush3.bf16.xpose.msk.msra.mxu1 %vm2873_vm6, %v2302_v48 }
 0x585   : > { %2305 = vmatprep.subr.bf16.mxu1 %v2473_v19 }
 0x586   : > { %v2318_v14 = vpack.c.bf16 %v1594_v59, %v1593_v63 }
 0x58c   : > { %2308 = vmatpush3.bf16.xpose.msk.msra.mxu1 %vm2873_vm6, %v2306_v55 }
 0x58d   : > { %2309 = vmatprep.subr.bf16.mxu1 %v2473_v19 }
 0x594   : > { %2312 = vmatpush3.bf16.xpose.msk.msra.mxu1 %vm2873_vm6, %v2310_v1 }
 0x595   : > { %2313 = vmatprep.subr.bf16.mxu1 %v2473_v19 }
 0x59c   : > { %2316 = vmatpush3.bf16.xpose.msk.msra.mxu1 %vm2873_vm6, %v2314_v10 }
 0x59d   : > { %2317 = vmatprep.subr.bf16.mxu1 %v2473_v19 }
 0x5a4   : > { %2320 = vmatpush3.bf16.xpose.msk.msra.mxu1 %vm2873_vm6, %v2318_v14 }
 0x5ab   : > { %2231 = vmatmul.mubr.msk.f32.vlgmr.msra.gmra.mrb[32].mxu1 %vm1606_vm5, %v1595_v15 }
 0x67e   : > { %v1724_v20 = vpop.f32.mrb[32].mxu1 }
 0x67f   : > { %v1725_v19 = vadd.f32 %v1724_v20, %v1605_v11  ;;  %v2232_v21 = vpop.f32.mrb[33].mxu1 }
 0x681   : > { %1728 = vst [vmem:[%s327_s27] sm:$0x1] %v1725_v19 }
 0x682   : > { %2421 = shalt.err (!%p2418_p3)
}
 0x683   : > { %s2422_s26 = scalar_lea.hbm %s2909_s10, 16  ;;  %s2426_s25 = scalar_lea.hbm %s2960_s9, 48 }
 0x684   : > { %p2423_p4 = scmp.ne.s32.totalorder %s2909_s10, %s2422_s26  ;;  %p2427_p9 = scmp.lt.u32.totalorder %s2909_s10, %s2960_s9 }
 0x685   : > { %p2428_p10 = scmp.lt.u32.totalorder %s2426_s25, %s2422_s26  ;;  %p2430_p12 = scmp.lt.u32.totalorder %s2422_s26, %s2909_s10 }
 0x686   : > { %p2424_p7 = pnand %p2423_p4, %p2565_p5 }
 0x687   : > { %p2429_p11 = por %p2428_p10, %p2427_p9 }
 0x688   : > { %p2425_p8 = pneg %p2424_p7 }
 0x689   : > { %p2431_p13 = por %p2430_p12, %p2429_p11 }
 0x68b   : > { %p2432_p0 = pnand %p2431_p13, %p2425_p8 }
 0x68d   : > { %2435 = shalt.err (!%p2432_p0)
}
 0x68e   : > { %2321 = dma.vmem_to_hbm [thread:$0]  (%p2565_p5), %s2911_s28, 16, %s2909_s10, %s1730_s15  }
 0x68f PF: > { %p2327_p1 = scmp.ge.s32.totalorder %s2470_s14, 2  ;;  %s1754_s30 = sand.u32 1, %s2458_s11  }
 0x690   : > { %s1755_s8 = scalar_lea.sflag [#allocation4], %s1754_s30 }
 0x691   : > { %p2324_p2 = pnand %p2327_p1, %p2569_p6 }
 0x693   : > { %2453 = dma.done.wait (!%p2324_p2), %s1755_s8, 16  }
 0x694   : > { %2455 = vsyncadd (!%p2324_p2), %s1755_s8, 4294967280  ;;  %p21_p3 = scmp.ge.s32.totalorder %s2553_s16, 5   ;;  %s2965_s11 = smov %s2462_s12 }
 0x695   : > { %s2966_s12 = smov %s2466_s13  ;;  %s2967_s13 = smov %s2563_s19 }
 0x696   : > { %s2968_s14 = smov %s2553_s16  ;;  %23 = sbr.rel (!%p21_p3) target bundleno = 6 (0x6), region = 91 }
 0x69d   :  { %1759 = vsyncpa [#allocation4], 1 }
 0x69e   :  { %1761 = vsyncpa [#allocation4 + $0x1], 1 }

</bundles_post_ra>
